<compile_context>
chip_gen: v7x
topology: tpu7x:2x2x1
jax: 0.10.0
libtpu: 0.0.40
codegen_flags: <defaults>
</compile_context>

<pallas_src>
import functools
import math

import jax
import jax.numpy as jnp
from jax.experimental import pallas as pl
from jax.experimental.pallas import tpu as pltpu


def _embed_kernel(ids_smem, table_hbm, out_ref, gather_buf, sems, *,
                  scale, tile_tokens, n_sem, vocab_size):
    """Gather `tile_tokens` embedding rows from HBM, write one scaled tile.

    ids_smem   : (n_pad_tokens,) int32 token ids in SMEM (scalar prefetch)
    table_hbm  : (V, D_pad) embedding table, left in HBM (memory_space=pl.ANY)
    out_ref    : (tile_tokens, D_pad) output tile (VMEM, pipelined by Pallas)
    gather_buf : (tile_tokens, D_pad) VMEM scratch holding the gathered rows
    sems       : (n_sem,) DMA semaphores -> up to n_sem row copies in flight
    """
    base = pl.program_id(0) * tile_tokens

    def start(t):
        # Clamp so padded / out-of-range ids never cause an OOB HBM DMA.
        rid = jnp.clip(ids_smem[base + t], 0, vocab_size - 1)
        pltpu.make_async_copy(
            table_hbm.at[pl.ds(rid, 1), :],
            gather_buf.at[pl.ds(t, 1), :],
            sems.at[t % n_sem],
        ).start()

    def wait(t):
        # Source index is irrelevant for the wait; only the transfer size matters.
        pltpu.make_async_copy(
            table_hbm.at[pl.ds(0, 1), :],
            gather_buf.at[pl.ds(t, 1), :],
            sems.at[t % n_sem],
        ).wait()

    # Prime the DMA window: up to n_sem row gathers in flight.
    for t in range(min(n_sem, tile_tokens)):
        start(t)

    # Retire one row per iteration and immediately refill the window.
    @pl.loop(0, tile_tokens)
    def _(t):
        wait(t)

        @pl.when(t + n_sem < tile_tokens)
        def _():
            start(t + n_sem)

    # Single sublane/lane-dense scaled writeback of the whole tile.
    # Multiply kept in f32; cast only on the store.
    out_ref[...] = (gather_buf[...].astype(jnp.float32) * scale).astype(out_ref.dtype)


def input_embeddings(ids, emb_table, *, tokens_per_tile=256, n_sem=8):
    """ids: (B, S) int token indices; emb_table: (V, D). Returns (B, S, D)."""
    B, S = ids.shape
    V, D = emb_table.shape
    n_tokens = B * S

    # Lane-dense feature dim: pad D up to a multiple of 128 (no-op for real
    # model dims such as 1024/4096; padding is sliced off the output).
    D_pad = ((D + 127) // 128) * 128
    table = emb_table if D_pad == D else jnp.pad(emb_table, ((0, 0), (0, D_pad - D)))

    # Tokens per grid step: sublane-dense (multiple of 8).  T=256 keeps the
    # double-buffered (T, D_pad) output + gather scratch ~12 MiB at D=4096 f32,
    # comfortably inside v7x's smaller VMEM as well as v5e/v6e.
    T = min(tokens_per_tile, n_tokens)
    T = max(8, ((T + 7) // 8) * 8)
    n_tiles = (n_tokens + T - 1) // T
    n_pad_tokens = n_tiles * T
    n_sem_eff = min(n_sem, T)

    flat_ids = ids.reshape(n_tokens).astype(jnp.int32)
    if n_pad_tokens != n_tokens:
        flat_ids = jnp.pad(flat_ids, (0, n_pad_tokens - n_tokens))

    scale = math.sqrt(D)  # sqrt(d_model) of the true (unpadded) dimension

    kernel = functools.partial(
        _embed_kernel,
        scale=scale,
        tile_tokens=T,
        n_sem=n_sem_eff,
        vocab_size=V,
    )

    out_flat = pl.pallas_call(
        kernel,
        grid_spec=pltpu.PrefetchScalarGridSpec(
            num_scalar_prefetch=1,                         # flat ids -> SMEM
            grid=(n_tiles,),
            in_specs=[pl.BlockSpec(memory_space=pl.ANY)],  # table stays in HBM
            out_specs=pl.BlockSpec((T, D_pad), lambda i, ids_ref: (i, 0)),
            scratch_shapes=[
                pltpu.VMEM((T, D_pad), table.dtype),       # gathered rows
                pltpu.SemaphoreType.DMA((n_sem_eff,)),     # in-flight row DMAs
            ],
        ),
        out_shape=jax.ShapeDtypeStruct((n_pad_tokens, D_pad), emb_table.dtype),
        compiler_params=pltpu.CompilerParams(
            # Token tiles are fully independent -> shard across both TCs on
            # v7x; neutral on single-core v5e/v6e.
            dimension_semantics=("parallel",),
        ),
    )(flat_ids, table)

    return out_flat[:n_tokens, :D].reshape(B, S, D)


if __name__ == "__main__":
    # Small shapes consistent with the module's forward pass.
    batch, seq = 2, 8
    vocab_size, d_model = 64, 32

    key = jax.random.PRNGKey(0)
    k_ids, k_emb = jax.random.split(key)

    # Deterministic parameter init (nn.Embedding default: N(0, 1)).
    emb_table = jax.random.normal(k_emb, (vocab_size, d_model), dtype=jnp.float32)
    x = jax.random.randint(k_ids, (batch, seq), 0, vocab_size, dtype=jnp.int32)

    out = input_embeddings(x, emb_table)
    out = jax.block_until_ready(out)

    # Reference check (plain JAX) — no extra output on success.
    ref = jnp.take(emb_table, x, axis=0) * math.sqrt(d_model)
    assert out.shape == (batch, seq, d_model)
    assert jnp.allclose(out, ref, atol=1e-5, rtol=1e-5)

    print("KERNEL_OK")
</pallas_src>

<mosaic_0001>
module attributes {stable_mosaic.version = 11 : i64} {
  func.func @_embed_kernel(%arg0: i32, %arg1: memref<16xi32, #tpu.memory_space<smem>>, %arg2: memref<64x128xf32, #tpu.memory_space<any>>, %arg3: memref<16x128xf32, #tpu.memory_space<vmem>>, %arg4: memref<16x128xf32, #tpu.memory_space<vmem>>, %arg5: memref<8x!tpu.dma_semaphore, #tpu.memory_space<semaphore_mem>>) attributes {dimension_semantics = [#tpu.dimension_semantics<parallel>], iteration_bounds = array<i64: 1>, scalar_prefetch = 1 : i64, scratch_operands = 2 : i64, tpu.core_type = #tpu.core_type<tc>, window_params = [{}, {transform_indices = @transform_1, window_bounds = array<i64: 16, 128>}]} {
    %c16_i32 = arith.constant 16 : i32
    %0 = arith.muli %arg0, %c16_i32 : i32
    %c0_i32 = arith.constant 0 : i32
    %1 = arith.addi %0, %c0_i32 : i32
    %2 = arith.index_cast %1 : i32 to index
    %3 = memref.load %arg1[%2] : memref<16xi32, #tpu.memory_space<smem>>
    %c0_i32_0 = arith.constant 0 : i32
    %c63_i32 = arith.constant 63 : i32
    %4 = arith.maxsi %c0_i32_0, %3 : i32
    %5 = arith.minsi %c63_i32, %4 : i32
    %c0_i32_1 = arith.constant 0 : i32
    %c0_i32_2 = arith.constant 0 : i32
    %6 = tpu.memref_slice %arg2[%5, %c0_i32_2] : memref<64x128xf32, #tpu.memory_space<any>> -> memref<1x128xf32, #tpu.memory_space<any>>
    %c0_i32_3 = arith.constant 0 : i32
    %c0_i32_4 = arith.constant 0 : i32
    %7 = tpu.memref_slice %arg4[%c0_i32_3, %c0_i32_4] : memref<16x128xf32, #tpu.memory_space<vmem>> -> memref<1x128xf32, #tpu.memory_space<vmem>>
    %8 = tpu.memref_slice %arg5[%c0_i32_1] : memref<8x!tpu.dma_semaphore, #tpu.memory_space<semaphore_mem>> -> memref<1x!tpu.dma_semaphore, #tpu.memory_space<semaphore_mem>>
    %9 = tpu.memref_squeeze %8 : memref<1x!tpu.dma_semaphore, #tpu.memory_space<semaphore_mem>> -> memref<!tpu.dma_semaphore, #tpu.memory_space<semaphore_mem>>
    tpu.enqueue_dma source(%6 : memref<1x128xf32, #tpu.memory_space<any>>) target(%7 : memref<1x128xf32, #tpu.memory_space<vmem>>) target_semaphore(%9 : memref<!tpu.dma_semaphore, #tpu.memory_space<semaphore_mem>>)
    %c1_i32 = arith.constant 1 : i32
    %10 = arith.addi %0, %c1_i32 : i32
    %11 = arith.index_cast %10 : i32 to index
    %12 = memref.load %arg1[%11] : memref<16xi32, #tpu.memory_space<smem>>
    %c0_i32_5 = arith.constant 0 : i32
    %c63_i32_6 = arith.constant 63 : i32
    %13 = arith.maxsi %c0_i32_5, %12 : i32
    %14 = arith.minsi %c63_i32_6, %13 : i32
    %c1_i32_7 = arith.constant 1 : i32
    %c0_i32_8 = arith.constant 0 : i32
    %15 = tpu.memref_slice %arg2[%14, %c0_i32_8] : memref<64x128xf32, #tpu.memory_space<any>> -> memref<1x128xf32, #tpu.memory_space<any>>
    %c1_i32_9 = arith.constant 1 : i32
    %c0_i32_10 = arith.constant 0 : i32
    %16 = tpu.memref_slice %arg4[%c1_i32_9, %c0_i32_10] : memref<16x128xf32, #tpu.memory_space<vmem>> -> memref<1x128xf32, #tpu.memory_space<vmem>>
    %17 = tpu.memref_slice %arg5[%c1_i32_7] : memref<8x!tpu.dma_semaphore, #tpu.memory_space<semaphore_mem>> -> memref<1x!tpu.dma_semaphore, #tpu.memory_space<semaphore_mem>>
    %18 = tpu.memref_squeeze %17 : memref<1x!tpu.dma_semaphore, #tpu.memory_space<semaphore_mem>> -> memref<!tpu.dma_semaphore, #tpu.memory_space<semaphore_mem>>
    tpu.enqueue_dma source(%15 : memref<1x128xf32, #tpu.memory_space<any>>) target(%16 : memref<1x128xf32, #tpu.memory_space<vmem>>) target_semaphore(%18 : memref<!tpu.dma_semaphore, #tpu.memory_space<semaphore_mem>>)
    %c2_i32 = arith.constant 2 : i32
    %19 = arith.addi %0, %c2_i32 : i32
    %20 = arith.index_cast %19 : i32 to index
    %21 = memref.load %arg1[%20] : memref<16xi32, #tpu.memory_space<smem>>
    %c0_i32_11 = arith.constant 0 : i32
    %c63_i32_12 = arith.constant 63 : i32
    %22 = arith.maxsi %c0_i32_11, %21 : i32
    %23 = arith.minsi %c63_i32_12, %22 : i32
    %c2_i32_13 = arith.constant 2 : i32
    %c0_i32_14 = arith.constant 0 : i32
    %24 = tpu.memref_slice %arg2[%23, %c0_i32_14] : memref<64x128xf32, #tpu.memory_space<any>> -> memref<1x128xf32, #tpu.memory_space<any>>
    %c2_i32_15 = arith.constant 2 : i32
    %c0_i32_16 = arith.constant 0 : i32
    %25 = tpu.memref_slice %arg4[%c2_i32_15, %c0_i32_16] : memref<16x128xf32, #tpu.memory_space<vmem>> -> memref<1x128xf32, #tpu.memory_space<vmem>>
    %26 = tpu.memref_slice %arg5[%c2_i32_13] : memref<8x!tpu.dma_semaphore, #tpu.memory_space<semaphore_mem>> -> memref<1x!tpu.dma_semaphore, #tpu.memory_space<semaphore_mem>>
    %27 = tpu.memref_squeeze %26 : memref<1x!tpu.dma_semaphore, #tpu.memory_space<semaphore_mem>> -> memref<!tpu.dma_semaphore, #tpu.memory_space<semaphore_mem>>
    tpu.enqueue_dma source(%24 : memref<1x128xf32, #tpu.memory_space<any>>) target(%25 : memref<1x128xf32, #tpu.memory_space<vmem>>) target_semaphore(%27 : memref<!tpu.dma_semaphore, #tpu.memory_space<semaphore_mem>>)
    %c3_i32 = arith.constant 3 : i32
    %28 = arith.addi %0, %c3_i32 : i32
    %29 = arith.index_cast %28 : i32 to index
    %30 = memref.load %arg1[%29] : memref<16xi32, #tpu.memory_space<smem>>
    %c0_i32_17 = arith.constant 0 : i32
    %c63_i32_18 = arith.constant 63 : i32
    %31 = arith.maxsi %c0_i32_17, %30 : i32
    %32 = arith.minsi %c63_i32_18, %31 : i32
    %c3_i32_19 = arith.constant 3 : i32
    %c0_i32_20 = arith.constant 0 : i32
    %33 = tpu.memref_slice %arg2[%32, %c0_i32_20] : memref<64x128xf32, #tpu.memory_space<any>> -> memref<1x128xf32, #tpu.memory_space<any>>
    %c3_i32_21 = arith.constant 3 : i32
    %c0_i32_22 = arith.constant 0 : i32
    %34 = tpu.memref_slice %arg4[%c3_i32_21, %c0_i32_22] : memref<16x128xf32, #tpu.memory_space<vmem>> -> memref<1x128xf32, #tpu.memory_space<vmem>>
    %35 = tpu.memref_slice %arg5[%c3_i32_19] : memref<8x!tpu.dma_semaphore, #tpu.memory_space<semaphore_mem>> -> memref<1x!tpu.dma_semaphore, #tpu.memory_space<semaphore_mem>>
    %36 = tpu.memref_squeeze %35 : memref<1x!tpu.dma_semaphore, #tpu.memory_space<semaphore_mem>> -> memref<!tpu.dma_semaphore, #tpu.memory_space<semaphore_mem>>
    tpu.enqueue_dma source(%33 : memref<1x128xf32, #tpu.memory_space<any>>) target(%34 : memref<1x128xf32, #tpu.memory_space<vmem>>) target_semaphore(%36 : memref<!tpu.dma_semaphore, #tpu.memory_space<semaphore_mem>>)
    %c4_i32 = arith.constant 4 : i32
    %37 = arith.addi %0, %c4_i32 : i32
    %38 = arith.index_cast %37 : i32 to index
    %39 = memref.load %arg1[%38] : memref<16xi32, #tpu.memory_space<smem>>
    %c0_i32_23 = arith.constant 0 : i32
    %c63_i32_24 = arith.constant 63 : i32
    %40 = arith.maxsi %c0_i32_23, %39 : i32
    %41 = arith.minsi %c63_i32_24, %40 : i32
    %c4_i32_25 = arith.constant 4 : i32
    %c0_i32_26 = arith.constant 0 : i32
    %42 = tpu.memref_slice %arg2[%41, %c0_i32_26] : memref<64x128xf32, #tpu.memory_space<any>> -> memref<1x128xf32, #tpu.memory_space<any>>
    %c4_i32_27 = arith.constant 4 : i32
    %c0_i32_28 = arith.constant 0 : i32
    %43 = tpu.memref_slice %arg4[%c4_i32_27, %c0_i32_28] : memref<16x128xf32, #tpu.memory_space<vmem>> -> memref<1x128xf32, #tpu.memory_space<vmem>>
    %44 = tpu.memref_slice %arg5[%c4_i32_25] : memref<8x!tpu.dma_semaphore, #tpu.memory_space<semaphore_mem>> -> memref<1x!tpu.dma_semaphore, #tpu.memory_space<semaphore_mem>>
    %45 = tpu.memref_squeeze %44 : memref<1x!tpu.dma_semaphore, #tpu.memory_space<semaphore_mem>> -> memref<!tpu.dma_semaphore, #tpu.memory_space<semaphore_mem>>
    tpu.enqueue_dma source(%42 : memref<1x128xf32, #tpu.memory_space<any>>) target(%43 : memref<1x128xf32, #tpu.memory_space<vmem>>) target_semaphore(%45 : memref<!tpu.dma_semaphore, #tpu.memory_space<semaphore_mem>>)
    %c5_i32 = arith.constant 5 : i32
    %46 = arith.addi %0, %c5_i32 : i32
    %47 = arith.index_cast %46 : i32 to index
    %48 = memref.load %arg1[%47] : memref<16xi32, #tpu.memory_space<smem>>
    %c0_i32_29 = arith.constant 0 : i32
    %c63_i32_30 = arith.constant 63 : i32
    %49 = arith.maxsi %c0_i32_29, %48 : i32
    %50 = arith.minsi %c63_i32_30, %49 : i32
    %c5_i32_31 = arith.constant 5 : i32
    %c0_i32_32 = arith.constant 0 : i32
    %51 = tpu.memref_slice %arg2[%50, %c0_i32_32] : memref<64x128xf32, #tpu.memory_space<any>> -> memref<1x128xf32, #tpu.memory_space<any>>
    %c5_i32_33 = arith.constant 5 : i32
    %c0_i32_34 = arith.constant 0 : i32
    %52 = tpu.memref_slice %arg4[%c5_i32_33, %c0_i32_34] : memref<16x128xf32, #tpu.memory_space<vmem>> -> memref<1x128xf32, #tpu.memory_space<vmem>>
    %53 = tpu.memref_slice %arg5[%c5_i32_31] : memref<8x!tpu.dma_semaphore, #tpu.memory_space<semaphore_mem>> -> memref<1x!tpu.dma_semaphore, #tpu.memory_space<semaphore_mem>>
    %54 = tpu.memref_squeeze %53 : memref<1x!tpu.dma_semaphore, #tpu.memory_space<semaphore_mem>> -> memref<!tpu.dma_semaphore, #tpu.memory_space<semaphore_mem>>
    tpu.enqueue_dma source(%51 : memref<1x128xf32, #tpu.memory_space<any>>) target(%52 : memref<1x128xf32, #tpu.memory_space<vmem>>) target_semaphore(%54 : memref<!tpu.dma_semaphore, #tpu.memory_space<semaphore_mem>>)
    %c6_i32 = arith.constant 6 : i32
    %55 = arith.addi %0, %c6_i32 : i32
    %56 = arith.index_cast %55 : i32 to index
    %57 = memref.load %arg1[%56] : memref<16xi32, #tpu.memory_space<smem>>
    %c0_i32_35 = arith.constant 0 : i32
    %c63_i32_36 = arith.constant 63 : i32
    %58 = arith.maxsi %c0_i32_35, %57 : i32
    %59 = arith.minsi %c63_i32_36, %58 : i32
    %c6_i32_37 = arith.constant 6 : i32
    %c0_i32_38 = arith.constant 0 : i32
    %60 = tpu.memref_slice %arg2[%59, %c0_i32_38] : memref<64x128xf32, #tpu.memory_space<any>> -> memref<1x128xf32, #tpu.memory_space<any>>
    %c6_i32_39 = arith.constant 6 : i32
    %c0_i32_40 = arith.constant 0 : i32
    %61 = tpu.memref_slice %arg4[%c6_i32_39, %c0_i32_40] : memref<16x128xf32, #tpu.memory_space<vmem>> -> memref<1x128xf32, #tpu.memory_space<vmem>>
    %62 = tpu.memref_slice %arg5[%c6_i32_37] : memref<8x!tpu.dma_semaphore, #tpu.memory_space<semaphore_mem>> -> memref<1x!tpu.dma_semaphore, #tpu.memory_space<semaphore_mem>>
    %63 = tpu.memref_squeeze %62 : memref<1x!tpu.dma_semaphore, #tpu.memory_space<semaphore_mem>> -> memref<!tpu.dma_semaphore, #tpu.memory_space<semaphore_mem>>
    tpu.enqueue_dma source(%60 : memref<1x128xf32, #tpu.memory_space<any>>) target(%61 : memref<1x128xf32, #tpu.memory_space<vmem>>) target_semaphore(%63 : memref<!tpu.dma_semaphore, #tpu.memory_space<semaphore_mem>>)
    %c7_i32 = arith.constant 7 : i32
    %64 = arith.addi %0, %c7_i32 : i32
    %65 = arith.index_cast %64 : i32 to index
    %66 = memref.load %arg1[%65] : memref<16xi32, #tpu.memory_space<smem>>
    %c0_i32_41 = arith.constant 0 : i32
    %c63_i32_42 = arith.constant 63 : i32
    %67 = arith.maxsi %c0_i32_41, %66 : i32
    %68 = arith.minsi %c63_i32_42, %67 : i32
    %c7_i32_43 = arith.constant 7 : i32
    %c0_i32_44 = arith.constant 0 : i32
    %69 = tpu.memref_slice %arg2[%68, %c0_i32_44] : memref<64x128xf32, #tpu.memory_space<any>> -> memref<1x128xf32, #tpu.memory_space<any>>
    %c7_i32_45 = arith.constant 7 : i32
    %c0_i32_46 = arith.constant 0 : i32
    %70 = tpu.memref_slice %arg4[%c7_i32_45, %c0_i32_46] : memref<16x128xf32, #tpu.memory_space<vmem>> -> memref<1x128xf32, #tpu.memory_space<vmem>>
    %71 = tpu.memref_slice %arg5[%c7_i32_43] : memref<8x!tpu.dma_semaphore, #tpu.memory_space<semaphore_mem>> -> memref<1x!tpu.dma_semaphore, #tpu.memory_space<semaphore_mem>>
    %72 = tpu.memref_squeeze %71 : memref<1x!tpu.dma_semaphore, #tpu.memory_space<semaphore_mem>> -> memref<!tpu.dma_semaphore, #tpu.memory_space<semaphore_mem>>
    tpu.enqueue_dma source(%69 : memref<1x128xf32, #tpu.memory_space<any>>) target(%70 : memref<1x128xf32, #tpu.memory_space<vmem>>) target_semaphore(%72 : memref<!tpu.dma_semaphore, #tpu.memory_space<semaphore_mem>>)
    %c0_i32_47 = arith.constant 0 : i32
    %c16_i32_48 = arith.constant 16 : i32
    %73 = arith.addi %c0_i32_47, %c16_i32_48 : i32
    %c1_i32_49 = arith.constant 1 : i32
    scf.for %arg6 = %c0_i32_47 to %73 step %c1_i32_49  : i32 {
      %c1_i32_54 = arith.constant 1 : i32
      %78 = arith.muli %arg6, %c1_i32_54 : i32
      %c0_i32_55 = arith.constant 0 : i32
      %79 = arith.addi %c0_i32_55, %78 : i32
      %c8_i32 = arith.constant 8 : i32
      %c0_i32_56 = arith.constant 0 : i32
      %80 = arith.cmpi eq, %c8_i32, %c0_i32_56 : i32
      %c1_i32_57 = arith.constant 1 : i32
      %81 = arith.select %80, %c1_i32_57, %c8_i32 : i32
      %82 = arith.remsi %79, %81 : i32
      %c0_i32_58 = arith.constant 0 : i32
      %83 = arith.cmpi ne, %82, %c0_i32_58 : i32
      %c0_i32_59 = arith.constant 0 : i32
      %84 = arith.cmpi slt, %82, %c0_i32_59 : i32
      %c0_i32_60 = arith.constant 0 : i32
      %85 = arith.cmpi slt, %81, %c0_i32_60 : i32
      %86 = arith.xori %84, %85 : i1
      %87 = arith.andi %86, %83 : i1
      %88 = arith.addi %82, %81 : i32
      %89 = arith.select %87, %88, %82 : i32
      %c0_i32_61 = arith.constant 0 : i32
      %c0_i32_62 = arith.constant 0 : i32
      %90 = tpu.memref_slice %arg2[%c0_i32_61, %c0_i32_62] : memref<64x128xf32, #tpu.memory_space<any>> -> memref<1x128xf32, #tpu.memory_space<any>>
      %c0_i32_63 = arith.constant 0 : i32
      %91 = tpu.memref_slice %arg4[%79, %c0_i32_63] : memref<16x128xf32, #tpu.memory_space<vmem>> -> memref<1x128xf32, #tpu.memory_space<vmem>>
      %92 = tpu.memref_slice %arg5[%89] : memref<8x!tpu.dma_semaphore, #tpu.memory_space<semaphore_mem>> -> memref<1x!tpu.dma_semaphore, #tpu.memory_space<semaphore_mem>>
      %93 = tpu.memref_squeeze %92 : memref<1x!tpu.dma_semaphore, #tpu.memory_space<semaphore_mem>> -> memref<!tpu.dma_semaphore, #tpu.memory_space<semaphore_mem>>
      tpu.wait_dma2 semaphore(%93 : memref<!tpu.dma_semaphore, #tpu.memory_space<semaphore_mem>>) src(%90 : memref<1x128xf32, #tpu.memory_space<any>>) dst(%91 : memref<1x128xf32, #tpu.memory_space<vmem>>)
      %c8_i32_64 = arith.constant 8 : i32
      %94 = arith.addi %79, %c8_i32_64 : i32
      %c16_i32_65 = arith.constant 16 : i32
      %95 = arith.cmpi slt, %94, %c16_i32_65 : i32
      %96 = arith.extui %95 : i1 to i32
      %c0_i32_66 = arith.constant 0 : i32
      %97 = arith.cmpi ne, %96, %c0_i32_66 : i32
      scf.if %97 {
        %c8_i32_67 = arith.constant 8 : i32
        %98 = arith.addi %79, %c8_i32_67 : i32
        %99 = arith.addi %0, %98 : i32
        %100 = arith.index_cast %99 : i32 to index
        %101 = memref.load %arg1[%100] : memref<16xi32, #tpu.memory_space<smem>>
        %c0_i32_68 = arith.constant 0 : i32
        %c63_i32_69 = arith.constant 63 : i32
        %102 = arith.maxsi %c0_i32_68, %101 : i32
        %103 = arith.minsi %c63_i32_69, %102 : i32
        %c8_i32_70 = arith.constant 8 : i32
        %c0_i32_71 = arith.constant 0 : i32
        %104 = arith.cmpi eq, %c8_i32_70, %c0_i32_71 : i32
        %c1_i32_72 = arith.constant 1 : i32
        %105 = arith.select %104, %c1_i32_72, %c8_i32_70 : i32
        %106 = arith.remsi %98, %105 : i32
        %c0_i32_73 = arith.constant 0 : i32
        %107 = arith.cmpi ne, %106, %c0_i32_73 : i32
        %c0_i32_74 = arith.constant 0 : i32
        %108 = arith.cmpi slt, %106, %c0_i32_74 : i32
        %c0_i32_75 = arith.constant 0 : i32
        %109 = arith.cmpi slt, %105, %c0_i32_75 : i32
        %110 = arith.xori %108, %109 : i1
        %111 = arith.andi %110, %107 : i1
        %112 = arith.addi %106, %105 : i32
        %113 = arith.select %111, %112, %106 : i32
        %c0_i32_76 = arith.constant 0 : i32
        %114 = tpu.memref_slice %arg2[%103, %c0_i32_76] : memref<64x128xf32, #tpu.memory_space<any>> -> memref<1x128xf32, #tpu.memory_space<any>>
        %c0_i32_77 = arith.constant 0 : i32
        %115 = tpu.memref_slice %arg4[%98, %c0_i32_77] : memref<16x128xf32, #tpu.memory_space<vmem>> -> memref<1x128xf32, #tpu.memory_space<vmem>>
        %116 = tpu.memref_slice %arg5[%113] : memref<8x!tpu.dma_semaphore, #tpu.memory_space<semaphore_mem>> -> memref<1x!tpu.dma_semaphore, #tpu.memory_space<semaphore_mem>>
        %117 = tpu.memref_squeeze %116 : memref<1x!tpu.dma_semaphore, #tpu.memory_space<semaphore_mem>> -> memref<!tpu.dma_semaphore, #tpu.memory_space<semaphore_mem>>
        tpu.enqueue_dma source(%114 : memref<1x128xf32, #tpu.memory_space<any>>) target(%115 : memref<1x128xf32, #tpu.memory_space<vmem>>) target_semaphore(%117 : memref<!tpu.dma_semaphore, #tpu.memory_space<semaphore_mem>>)
      } else {
      }
    }
    %c16_i32_50 = arith.constant 16 : i32
    %c0 = arith.constant 0 : index
    %c0_51 = arith.constant 0 : index
    %74 = vector.load %arg4[%c0, %c0_51] : memref<16x128xf32, #tpu.memory_space<vmem>>, vector<16x128xf32>
    %cst = arith.constant 5.65685415 : f32
    %75 = vector.broadcast %cst : f32 to vector<16x128xf32>
    %76 = arith.mulf %74, %75 : vector<16x128xf32>
    %c0_52 = arith.constant 0 : index
    %c0_53 = arith.constant 0 : index
    %77 = vector.load %arg3[%c0_52, %c0_53] : memref<16x128xf32, #tpu.memory_space<vmem>>, vector<16x128xf32>
    tpu.vector_store %arg3[%c0_52, %c0_53], %76 {strides = array<i32>} : memref<16x128xf32, #tpu.memory_space<vmem>>, vector<16x128xf32>,
    return
  }
  func.func @transform_1(%arg0: i32, %arg1: memref<16xi32, #tpu.memory_space<smem>>) -> (i32, i32) {
    %c0_i32 = arith.constant 0 : i32
    %c0_i32_0 = arith.constant 0 : i32
    return %arg0, %c0_i32 : i32, i32
  }
}

</mosaic_0001>

<bundles_post_ra>
// kernel: tpu_custom_call.1
= control target key start
LH: loop header
LB: loop body
LE: loop exit
PB: predicated region body
PF: predicated region fallthrough
CT: control target
= control target key end

     0   :  { %s961_s0 = inlined_call_operand.hbm [shape: s32[16], index: 0, kind: input, shape index: {}]   ;;  %s962_s1 = inlined_call_operand.hbm [shape: f32[64,128], index: 1, kind: input, shape index: {}]   ;;  %s963_s2 = inlined_call_operand.hbm [shape: f32[16,128], index: 2, kind: output, shape index: {}]  }
   0x1   :  { %s461_s11 = scalar_lea.hbm %s961_s0, 16 }
   0x2   :  { %p462_p0 = scmp.ne.s32.totalorder %s961_s0, %s461_s11  ;;  %p465_p1 = scmp.lt.u32.totalorder %s461_s11, %s961_s0 }
   0x4   :  { %p467_p2 = pnand %p465_p1, %p462_p0 }
   0x6   :  { %470 = shalt.err (!%p467_p2)  }
   0x7   :  { %s727_s16 = smov [#allocation5]  }
   0x8   :  { %8 = dma.hbm_to_smem %s961_s0, 16, %s727_s16, [#allocation4] }
   0x9   :  { %717 = dma.done.wait [#allocation4], 16 }
   0xa   :  { %718 = vsyncadd [#allocation4], 4294967280 }
   0xb   :  { %10 = sfence }
   0xc   :  { %11 = vsyncpa [#allocation7], 0  ;;  %s13_s19 = sld [smem:[#allocation5]]  ;;  %s728_s20 = smov [#allocation2]  }
   0xd   :  { %s27_s21 = sshll.u32 %s728_s20, 4  ;;  %s348_s22 = sld [smem:[#allocation5 + $0x1]]  ;;  %s766_s21 = int_to_ptr.vmem [resolvable:$true] %s27_s21 }
   0xe   :  { %s729_s23 = smov [#allocation2 + $0x1]   ;;  %s768_s25 = sld [smem:[#allocation5 + $0x2]] }
   0xf   :  { %s48_s24 = sshll.u32 %s729_s23, 4  ;;  %s730_s26 = smov [#allocation2 + $0x2]   ;;  %s770_s24 = int_to_ptr.vmem [resolvable:$true] %s48_s24 }
  0x10   :  { %s772_s27 = sshll.u32 %s730_s26, 4  ;;  %s774_s0 = sld [smem:[#allocation5 + $0x3]]  ;;  %s70_s27 = int_to_ptr.vmem [resolvable:$true] %s772_s27 }
  0x11   :  { %s783_s8 = scalar_lea.hbm %s962_s1, 1024 }
  0x12   :  { %p14_p3 = scmp.gt.s32.totalorder %s13_s19, 0  ;;  %p342_p4 = scmp.lt.s32.totalorder %s13_s19, 63 }
  0x13   :  { %p33_p5 = scmp.gt.s32.totalorder %s348_s22, 0  ;;  %p349_p6 = scmp.lt.s32.totalorder %s348_s22, 63 }
  0x14   :  { %s966_s19 = smov (!%p14_p3, %s13_s19), 0  ;;  %p54_p7 = scmp.gt.s32.totalorder %s768_s25, 0 }
  0x15   :  { %s968_s22 = smov (!%p33_p5, %s348_s22), 0  ;;  %s970_s19 = smov (!%p342_p4, %s966_s19), 63 }
  0x16   :  { %s972_s22 = smov (!%p349_p6, %s968_s22), 63  ;;  %s347_s28 = sshll.u32 %s970_s19, 4 }
  0x17   :  { %s19_s3 = scalar_lea.hbm %s962_s1, %s347_s28  ;;  %s354_s4 = sshll.u32 %s972_s22, 4 }
  0x18   :  { %s471_s5 = scalar_lea.hbm %s19_s3, 16  ;;  %p474_p9 = scmp.lt.u32.totalorder %s19_s3, %s962_s1 }
  0x19   :  { %p472_p8 = scmp.ne.s32.totalorder %s19_s3, %s471_s5  ;;  %p475_p10 = scmp.lt.u32.totalorder %s783_s8, %s471_s5 }
  0x1a   :  { %p477_p12 = scmp.lt.u32.totalorder %s471_s5, %s19_s3 }
  0x1b   :  { %p476_p11 = por %p475_p10, %p474_p9 }
  0x1d   :  { %p478_p13 = por %p477_p12, %p476_p11 }
  0x1f   :  { %p479_p0 = pnand %p478_p13, %p472_p8 }
  0x21   :  { %482 = shalt.err (!%p479_p0)  }
  0x22   :  { %s483_s11 = scalar_lea.vmem %s766_s21, 16  ;;  %s792_s12 = scalar_lea.vmem %s766_s21, 256 }
  0x23   :  { %p484_p1 = scmp.ne.s32.totalorder %s766_s21, %s483_s11  ;;  %p488_p2 = scmp.lt.s32.totalorder %s766_s21, %s766_s21 }
  0x24   :  { %p489_p3 = scmp.lt.s32.totalorder %s792_s12, %s483_s11 }
  0x26   :  { %p490_p4 = por %p489_p3, %p488_p2 }
  0x28   :  { %p491_p5 = pnand %p490_p4, %p484_p1 }
  0x2a   :  { %494 = shalt.err (!%p491_p5)  }
  0x2b   :  { %30 = dma.hbm_to_vmem [thread:$0]  %s19_s3, 16, %s766_s21, [#allocation3] }
  0x2c   :  { %s38_s15 = scalar_lea.hbm %s962_s1, %s354_s4  ;;  %p356_p6 = scmp.lt.s32.totalorder %s768_s25, 63 }
  0x2d   :  { %s495_s16 = scalar_lea.hbm %s38_s15, 16  ;;  %p498_p9 = scmp.lt.u32.totalorder %s38_s15, %s962_s1 }
  0x2e   :  { %p496_p8 = scmp.ne.s32.totalorder %s38_s15, %s495_s16  ;;  %p499_p10 = scmp.lt.u32.totalorder %s783_s8, %s495_s16 }
  0x2f   :  { %p501_p12 = scmp.lt.u32.totalorder %s495_s16, %s38_s15 }
  0x30   :  { %p500_p11 = por %p499_p10, %p498_p9 }
  0x32   :  { %p502_p13 = por %p501_p12, %p500_p11 }
  0x34   :  { %p503_p0 = pnand %p502_p13, %p496_p8 }
  0x36   :  { %506 = shalt.err (!%p503_p0)  }
  0x37   :  { %s507_s19 = scalar_lea.vmem %s770_s24, 16  ;;  %p512_p2 = scmp.lt.s32.totalorder %s770_s24, %s766_s21 }
  0x38   :  { %p508_p1 = scmp.ne.s32.totalorder %s770_s24, %s507_s19  ;;  %p513_p3 = scmp.lt.s32.totalorder %s792_s12, %s507_s19 }
  0x3a   :  { %p514_p4 = por %p513_p3, %p512_p2 }
  0x3c   :  { %p515_p5 = pnand %p514_p4, %p508_p1 }
  0x3e   :  { %518 = shalt.err (!%p515_p5)  }
  0x3f   :  { %51 = dma.hbm_to_vmem [thread:$0]  %s38_s15, 16, %s770_s24, [#allocation3 + $0x1] }
  0x40   :  { %s55_s20 = scalar_select %p54_p7, %s768_s25, 0 }
  0x41   :  { %p75_p8 = scmp.gt.s32.totalorder %s774_s0, 0  ;;  %p363_p9 = scmp.lt.s32.totalorder %s774_s0, 63 }
  0x42   :  { %s974_s20 = smov (!%p356_p6, %s55_s20), 63 }
  0x43   :  { %s76_s22 = scalar_select %p75_p8, %s774_s0, 0 }
  0x44   :  { %s361_s23 = sshll.u32 %s974_s20, 4 }
  0x45   :  { %s59_s29 = scalar_lea.hbm %s962_s1, %s361_s23 }
  0x46   :  { %s519_s30 = scalar_lea.hbm %s59_s29, 16  ;;  %p522_p11 = scmp.lt.u32.totalorder %s59_s29, %s962_s1 }
  0x47   :  { %p520_p10 = scmp.ne.s32.totalorder %s59_s29, %s519_s30  ;;  %p523_p12 = scmp.lt.u32.totalorder %s783_s8, %s519_s30 }
  0x48   :  { %p525_p7 = scmp.lt.u32.totalorder %s519_s30, %s59_s29 }
  0x49   :  { %p524_p13 = por %p523_p12, %p522_p11 }
  0x4b   :  { %p526_p0 = por %p525_p7, %p524_p13 }
  0x4d   :  { %p527_p1 = pnand %p526_p0, %p520_p10 }
  0x4f   :  { %530 = shalt.err (!%p527_p1)  }
  0x50   :  { %s531_s24 = scalar_lea.vmem %s70_s27, 16  ;;  %p536_p2 = scmp.lt.s32.totalorder %s70_s27, %s766_s21 }
  0x51   :  { %p532_p6 = scmp.ne.s32.totalorder %s70_s27, %s531_s24  ;;  %p537_p3 = scmp.lt.s32.totalorder %s792_s12, %s531_s24 }
  0x53   :  { %p538_p4 = por %p537_p3, %p536_p2 }
  0x55   :  { %p539_p5 = pnand %p538_p4, %p532_p6 }
  0x57   :  { %542 = shalt.err (!%p539_p5)  }
  0x58   :  { %72 = dma.hbm_to_vmem [thread:$0]  %s59_s29, 16, %s70_s27, [#allocation3 + $0x2] }
  0x59   :  { %s976_s22 = smov (!%p363_p9, %s76_s22), 63  ;;  %s731_s25 = smov [#allocation2 + $0x3]  }
  0x5a   :  { %s90_s5 = sshll.u32 %s731_s25, 4  ;;  %s832_s6 = sld [smem:[#allocation5 + $0x4]]  ;;  %s91_s5 = int_to_ptr.vmem [resolvable:$true] %s90_s5 }
  0x5b   :  { %s368_s7 = sshll.u32 %s976_s22, 4 }
  0x5c   :  { %s80_s11 = scalar_lea.hbm %s962_s1, %s368_s7 }
  0x5d   :  { %s543_s13 = scalar_lea.hbm %s80_s11, 16  ;;  %p546_p10 = scmp.lt.u32.totalorder %s80_s11, %s962_s1 }
  0x5e   :  { %p544_p8 = scmp.ne.s32.totalorder %s80_s11, %s543_s13  ;;  %p547_p11 = scmp.lt.u32.totalorder %s783_s8, %s543_s13 }
  0x5f   :  { %p549_p13 = scmp.lt.u32.totalorder %s543_s13, %s80_s11 }
  0x60   :  { %p548_p12 = por %p547_p11, %p546_p10 }
  0x62   :  { %p550_p9 = por %p549_p13, %p548_p12 }
  0x64   :  { %p551_p7 = pnand %p550_p9, %p544_p8 }
  0x66   :  { %554 = shalt.err (!%p551_p7)  }
  0x67   :  { %s555_s27 = scalar_lea.vmem %s91_s5, 16  ;;  %p560_p1 = scmp.lt.s32.totalorder %s91_s5, %s766_s21 }
  0x68   :  { %p556_p0 = scmp.ne.s32.totalorder %s91_s5, %s555_s27  ;;  %p561_p6 = scmp.lt.s32.totalorder %s792_s12, %s555_s27 }
  0x6a   :  { %p562_p2 = por %p561_p6, %p560_p1 }
  0x6c   :  { %p563_p3 = pnand %p562_p2, %p556_p0 }
  0x6e   :  { %566 = shalt.err (!%p563_p3)  }
  0x6f   :  { %93 = dma.hbm_to_vmem [thread:$0]  %s80_s11, 16, %s91_s5, [#allocation3 + $0x3] }
  0x70   :  { %s843_s0 = sld [smem:[#allocation5 + $0x5]]  ;;  %s732_s16 = smov [#allocation2 + $0x4]  }
  0x71   :  { %s111_s17 = sshll.u32 %s732_s16, 4  ;;  %p96_p4 = scmp.gt.s32.totalorder %s832_s6, 0  ;;  %s112_s17 = int_to_ptr.vmem [resolvable:$true] %s111_s17 }
  0x72   :  { %p370_p5 = scmp.lt.s32.totalorder %s832_s6, 63  ;;  %s847_s18 = sld [smem:[#allocation5 + $0x6]] }
  0x73   :  { %s978_s6 = smov (!%p96_p4, %s832_s6), 0  ;;  %s733_s19 = smov [#allocation2 + $0x5]  }
  0x74   :  { %s132_s20 = sshll.u32 %s733_s19, 4  ;;  %s980_s6 = smov (!%p370_p5, %s978_s6), 63  ;;  %s133_s20 = int_to_ptr.vmem [resolvable:$true] %s132_s20 }
  0x75   :  { %s375_s22 = sshll.u32 %s980_s6, 4 }
  0x76   :  { %p117_p8 = scmp.gt.s32.totalorder %s843_s0, 0  ;;  %s101_s28 = scalar_lea.hbm %s962_s1, %s375_s22 }
  0x77   :  { %s567_s29 = scalar_lea.hbm %s101_s28, 16  ;;  %p570_p13 = scmp.lt.u32.totalorder %s101_s28, %s962_s1 }
  0x78   :  { %p138_p11 = scmp.gt.s32.totalorder %s847_s18, 0  ;;  %p568_p12 = scmp.ne.s32.totalorder %s101_s28, %s567_s29 }
  0x79   :  { %p571_p9 = scmp.lt.u32.totalorder %s783_s8, %s567_s29  ;;  %p573_p0 = scmp.lt.u32.totalorder %s567_s29, %s101_s28 }
  0x7b   :  { %p572_p7 = por %p571_p9, %p570_p13 }
  0x7d   :  { %p574_p1 = por %p573_p0, %p572_p7 }
  0x7f   :  { %p575_p6 = pnand %p574_p1, %p568_p12 }
  0x81   :  { %578 = shalt.err (!%p575_p6)  }
  0x82   :  { %s579_s4 = scalar_lea.vmem %s112_s17, 16  ;;  %p584_p3 = scmp.lt.s32.totalorder %s112_s17, %s766_s21 }
  0x83   :  { %p580_p2 = scmp.ne.s32.totalorder %s112_s17, %s579_s4  ;;  %p585_p4 = scmp.lt.s32.totalorder %s792_s12, %s579_s4 }
  0x85   :  { %p586_p5 = por %p585_p4, %p584_p3 }
  0x87   :  { %p587_p10 = pnand %p586_p5, %p580_p2 }
  0x89   :  { %590 = shalt.err (!%p587_p10)  }
  0x8a   :  { %114 = dma.hbm_to_vmem [thread:$0]  %s101_s28, 16, %s112_s17, [#allocation3 + $0x4] }
  0x8b   :  { %s118_s24 = scalar_select %p117_p8, %s843_s0, 0 }
  0x8c   :  { %s139_s25 = scalar_select %p138_p11, %s847_s18, 0 }
  0x8d   :  { %p964_p12 = scmp.lt.s32.totalorder %s843_s0, 63  ;;  %p384_p13 = scmp.lt.s32.totalorder %s847_s18, 63 }
  0x8e   :  { %s871_s6 = sld [smem:[#allocation5 + $0x7]]  ;;  %s734_s11 = smov [#allocation2 + $0x6]  }
  0x8f   :  { %s982_s24 = smov (!%p964_p12, %s118_s24), 63  ;;  %s153_s13 = sshll.u32 %s734_s11, 4  ;;  %s154_s13 = int_to_ptr.vmem [resolvable:$true] %s153_s13 }
  0x90   :  { %s382_s5 = sshll.u32 %s982_s24, 4 }
  0x91   :  { %s122_s10 = scalar_lea.hbm %s962_s1, %s382_s5 }
  0x92   :  { %s591_s14 = scalar_lea.hbm %s122_s10, 16  ;;  %p594_p8 = scmp.lt.u32.totalorder %s122_s10, %s962_s1 }
  0x93   :  { %p592_p10 = scmp.ne.s32.totalorder %s122_s10, %s591_s14  ;;  %p595_p11 = scmp.lt.u32.totalorder %s783_s8, %s591_s14 }
  0x94   :  { %p597_p7 = scmp.lt.u32.totalorder %s591_s14, %s122_s10 }
  0x95   :  { %p596_p9 = por %p595_p11, %p594_p8 }
  0x97   :  { %p598_p0 = por %p597_p7, %p596_p9 }
  0x99   :  { %p599_p1 = pnand %p598_p0, %p592_p10 }
  0x9b   :  { %602 = shalt.err (!%p599_p1)  }
  0x9c   :  { %s603_s0 = scalar_lea.vmem %s133_s20, 16  ;;  %p608_p2 = scmp.lt.s32.totalorder %s133_s20, %s766_s21 }
  0x9d   :  { %p604_p6 = scmp.ne.s32.totalorder %s133_s20, %s603_s0  ;;  %p609_p3 = scmp.lt.s32.totalorder %s792_s12, %s603_s0 }
  0x9f   :  { %p610_p4 = por %p609_p3, %p608_p2 }
  0xa1   :  { %p611_p5 = pnand %p610_p4, %p604_p6 }
  0xa3   :  { %614 = shalt.err (!%p611_p5)  }
  0xa4   :  { %135 = dma.hbm_to_vmem [thread:$0]  %s122_s10, 16, %s133_s20, [#allocation3 + $0x5] }
  0xa5   :  { %s984_s25 = smov (!%p384_p13, %s139_s25), 63  ;;  %p159_p12 = scmp.gt.s32.totalorder %s871_s6, 0 }
  0xa6   :  { %s389_s16 = sshll.u32 %s984_s25, 4 }
  0xa7   :  { %s143_s22 = scalar_lea.hbm %s962_s1, %s389_s16 }
  0xa8   :  { %s615_s23 = scalar_lea.hbm %s143_s22, 16  ;;  %p618_p8 = scmp.lt.u32.totalorder %s143_s22, %s962_s1 }
  0xa9   :  { %p616_p10 = scmp.ne.s32.totalorder %s143_s22, %s615_s23  ;;  %p619_p11 = scmp.lt.u32.totalorder %s783_s8, %s615_s23 }
  0xaa   :  { %p621_p7 = scmp.lt.u32.totalorder %s615_s23, %s143_s22 }
  0xab   :  { %p620_p9 = por %p619_p11, %p618_p8 }
  0xad   :  { %p622_p0 = por %p621_p7, %p620_p9 }
  0xaf   :  { %p623_p1 = pnand %p622_p0, %p616_p10 }
  0xb1   :  { %626 = shalt.err (!%p623_p1)  }
  0xb2   :  { %s627_s18 = scalar_lea.vmem %s154_s13, 16  ;;  %p632_p6 = scmp.lt.s32.totalorder %s154_s13, %s766_s21 }
  0xb3   :  { %p628_p13 = scmp.ne.s32.totalorder %s154_s13, %s627_s18  ;;  %p633_p2 = scmp.lt.s32.totalorder %s792_s12, %s627_s18 }
  0xb5   :  { %p634_p3 = por %p633_p2, %p632_p6 }
  0xb7   :  { %p635_p4 = pnand %p634_p3, %p628_p13 }
  0xb9   :  { %638 = shalt.err (!%p635_p4)  }
  0xba   :  { %156 = dma.hbm_to_vmem [thread:$0]  %s143_s22, 16, %s154_s13, [#allocation3 + $0x6] }
  0xbb   :  { %s160_s20 = scalar_select %p159_p12, %s871_s6, 0 }
  0xbc   :  { %p391_p5 = scmp.lt.s32.totalorder %s871_s6, 63  ;;  %s735_s29 = smov [#allocation2 + $0x7]  }
  0xbd   :  { %s174_s30 = sshll.u32 %s735_s29, 4  ;;  %s175_s30 = int_to_ptr.vmem [resolvable:$true] %s174_s30 }
  0xbe   :  { %s986_s20 = smov (!%p391_p5, %s160_s20), 63 }
  0xbf   :  { %s396_s3 = sshll.u32 %s986_s20, 4 }
  0xc0   :  { %s164_s25 = scalar_lea.hbm %s962_s1, %s396_s3 }
  0xc1   :  { %s639_s5 = scalar_lea.hbm %s164_s25, 16  ;;  %p642_p8 = scmp.lt.u32.totalorder %s164_s25, %s962_s1 }
  0xc2   :  { %p640_p10 = scmp.ne.s32.totalorder %s164_s25, %s639_s5  ;;  %p643_p11 = scmp.lt.u32.totalorder %s783_s8, %s639_s5 }
  0xc3   :  { %p645_p7 = scmp.lt.u32.totalorder %s639_s5, %s164_s25 }
  0xc4   :  { %p644_p9 = por %p643_p11, %p642_p8 }
  0xc6   :  { %p646_p12 = por %p645_p7, %p644_p9 }
  0xc8   :  { %p647_p0 = pnand %p646_p12, %p640_p10 }
  0xca   :  { %650 = shalt.err (!%p647_p0)  }
  0xcb   :  { %s651_s6 = scalar_lea.vmem %s175_s30, 16  ;;  %p656_p13 = scmp.lt.s32.totalorder %s175_s30, %s766_s21 }
  0xcc   :  { %p652_p1 = scmp.ne.s32.totalorder %s175_s30, %s651_s6  ;;  %p657_p6 = scmp.lt.s32.totalorder %s792_s12, %s651_s6 }
  0xce   :  { %p658_p2 = por %p657_p6, %p656_p13 }
  0xd0   :  { %p659_p3 = pnand %p658_p2, %p652_p1 }
  0xd2   :  { %662 = shalt.err (!%p659_p3)  }
  0xd3   :  { %177 = dma.hbm_to_vmem [thread:$0]  %s164_s25, 16, %s175_s30, [#allocation3 + $0x7] }
  0xd4   :  { %s907_s10 = smov 0  }
  0xd5 LB: > { %p184_p4 = scmp.lt.s32.totalorder %s725_s10, 0  ;;  %s185_s11 = ssub.s32 0, %s725_s10  ;;  %s725_s10 = sphi %s907_s10, %s183_s10  }
  0xd6   : > { %s397_s13 = smin.u32 %s725_s10, %s185_s11 }
  0xd7   : > { %s187_s14 = sand.u32 7, %s397_s13  }
  0xd8   : > { %s188_s15 = ssub.s32 0, %s187_s14 }
  0xd9   : > { %s988_s15 = smov (!%p184_p4, %s188_s15), %s187_s14 }
  0xda   : > { %p399_p5 = scmp.lt.s32.totalorder %s988_s15, 0  ;;  %s194_s27 = sadd.s32 8, %s988_s15 }
  0xdc   : > { %s990_s27 = smov (!%p399_p5, %s194_s27), %s988_s15 }
  0xdd   : > { %s196_s0 = scalar_lea.sflag [#allocation3], %s990_s27 }
  0xde   : > { %719 = dma.done.wait %s196_s0, 16 }
  0xdf   : > { %720 = vsyncadd %s196_s0, 4294967280  ;;  %s916_s16 = sadd.s32 8, %s725_s10  ;;  %s334_s20 = scalar_lea.vmem [#allocation2], %s725_s10 }
  0xe0   : > { %p440_p10 = scmp.lt.s32.totalorder %s916_s16, 16  ;;  %p211_p8 = scmp.lt.s32.totalorder %s916_s16, 0 }
  0xe1   : > { %s212_s17 = ssub.s32 0, %s916_s16  ;;  %s335_s29 = scalar_lea.vmem %s334_s20, 8 [#allocation2] }
  0xe2   : > { %s437_s19 = scalar_select %p440_p10, [#allocation5], [#allocation28] }
  0xe3   : > { %s438_s22 = scalar_select %p440_p10, %s916_s16, 0 }
  0xe4   : > { %s406_s23 = smin.u32 %s212_s17, %s916_s16  ;;  %s234_s3 = sshll.u32 %s335_s29, 4  ;;  %s235_s3 = int_to_ptr.vmem [resolvable:$true] %s234_s3 }
  0xe5   : > { %s206_s26 = sld [smem:[%s437_s19 + %s438_s22]]  ;;  %s214_s28 = sand.u32 7, %s406_s23  }
  0xe6   : > { %s215_s18 = ssub.s32 0, %s214_s28 }
  0xe7   : > { %s992_s18 = smov (!%p211_p8, %s215_s18), %s214_s28 }
  0xe8   : > { %p408_p11 = scmp.lt.s32.totalorder %s992_s18, 0  ;;  %s221_s30 = sadd.s32 8, %s992_s18 }
  0xea   : > { %s994_s30 = smov (!%p408_p11, %s221_s30), %s992_s18 }
  0xeb   : > { %p207_p9 = scmp.gt.s32.totalorder %s206_s26, 0  ;;  %p401_p7 = scmp.lt.s32.totalorder %s206_s26, 63 }
  0xec   : > { %s226_s7 = scalar_lea.sflag [#allocation3], %s994_s30 }
  0xed   : > { %s996_s26 = smov (!%p207_p9, %s206_s26), 0 }
  0xee   : > { %s998_s26 = smov (!%p401_p7, %s996_s26), 63 }
  0xef   : > { %s409_s4 = sshll.u32 %s998_s26, 4 }
  0xf0   : > { %s224_s5 = scalar_lea.hbm %s962_s1, %s409_s4 }
  0xf1   : > { %s663_s9 = scalar_lea.hbm %s224_s5, 16  ;;  %p668_p13 = scmp.lt.u32.totalorder %s224_s5, %s962_s1 }
  0xf2   : > { %p664_p12 = scmp.ne.s32.totalorder %s224_s5, %s663_s9  ;;  %p669_p6 = scmp.lt.u32.totalorder %s783_s8, %s663_s9 }
  0xf3   : > { %p671_p3 = scmp.lt.u32.totalorder %s663_s9, %s224_s5 }
  0xf4   : > { %p665_p0 = pnand %p664_p12, %p440_p10  ;;  %p670_p2 = por %p669_p6, %p668_p13 }
  0xf6   : > { %p666_p1 = pneg %p665_p0  ;;  %p672_p4 = por %p671_p3, %p670_p2 }
  0xf8   : > { %p673_p5 = pnand %p672_p4, %p666_p1 }
  0xfa   : > { %676 = shalt.err (!%p673_p5)  }
  0xfb   : > { %s677_s13 = scalar_lea.vmem %s235_s3, 16  ;;  %p684_p7 = scmp.lt.s32.totalorder %s235_s3, %s766_s21 }
  0xfc   : > { %p678_p8 = scmp.ne.s32.totalorder %s235_s3, %s677_s13  ;;  %p685_p12 = scmp.lt.s32.totalorder %s792_s12, %s677_s13 }
  0xfe   : > { %p679_p11 = pnand %p678_p8, %p440_p10  ;;  %p686_p0 = por %p685_p12, %p684_p7 }
 0x100   : > { %p680_p9 = pneg %p679_p11 }
 0x102   : > { %p687_p6 = pnand %p686_p0, %p680_p9 }
 0x104   : > { %690 = shalt.err (!%p687_p6)  }
 0x105   : > { %439 = dma.hbm_to_vmem [thread:$0]  (%p440_p10), %s224_s5, 16, %s235_s3, %s226_s7 }
 0x106   : > { %s183_s10 = sadd.s32 1, %s725_s10  }
 0x107   : > { %p180_p1 = scmp.ge.s32.totalorder %s183_s10, 16  }
 0x108   :  { %v238_v0 = vld [vmem:[#allocation2] sm:$0xff] (%p180_p1)  ;;  %v239_v1 = vld [vmem:[#allocation2 + $0x8] sm:$0xff] (%p180_p1)  ;;  %s736_s14 = smov (%p180_p1), [#allocation6]  }
 0x109   :  { %182 = sbr.rel (!%p180_p1) target bundleno = 213 (0xd5), region = 100  ;;  %v240_v2 = vmul.f32 (%p180_p1), 5.656854, %v238_v0  ;;  %v241_v3 = vmul.f32 (%p180_p1), 5.656854, %v239_v1  ;;  %s249_s15 = sshll.u32 (%p180_p1), %s736_s14, 4  ;;  %s250_s15 = int_to_ptr.vmem [resolvable:$true] %s249_s15 }
 0x10a   :  { %s691_s27 = scalar_lea.vmem (%p180_p1), %s250_s15, 256  ;;  %p696_p2 = scmp.lt.s32.totalorder (%p180_p1), %s250_s15, %s250_s15 }
 0x10b   :  { %242 = vst [vmem:[#allocation6] sm:$0xff] (%p180_p1), %v240_v2  ;;  %243 = vst [vmem:[#allocation6 + $0x8] sm:$0xff] (%p180_p1), %v241_v3  ;;  %p692_p13 = scmp.ne.s32.totalorder (%p180_p1), %s250_s15, %s691_s27  ;;  %p697_p3 = scmp.lt.s32.totalorder (%p180_p1), %s691_s27, %s691_s27 }
 0x10d   :  { %p698_p10 = por (%p180_p1), %p697_p3, %p696_p2 }
 0x10f   :  { %p699_p4 = pnand (%p180_p1), %p698_p10, %p692_p13 }
 0x111   :  { %702 = shalt.err (!%p699_p4)
}
 0x112   :  { %s703_s10 = scalar_lea.hbm %s963_s2, 256 }
 0x113   :  { %p704_p5 = scmp.ne.s32.totalorder %s963_s2, %s703_s10  ;;  %p707_p8 = scmp.lt.u32.totalorder %s703_s10, %s963_s2 }
 0x115   :  { %p709_p11 = pnand %p707_p8, %p704_p5 }
 0x117   :  { %712 = shalt.err (!%p709_p11)
}
 0x118   :  { %s737_s17 = smov 128   ;;  %s738_s19 = smov 8  }
 0x119   :  { %255 = dma.vmem_to_hbm [thread:$0]  %s250_s15, 256, %s963_s2, [#allocation7], %s737_s17, %s737_s17, %s738_s19  }
 0x11a   :  { %721 = dma.done.wait [#allocation7], 256  }
 0x11b   :  { %722 = vsyncadd [#allocation7], 4294967040 }
 0x11c   :  { %259 = vsyncpa [#allocation7], 1 }
 0x11d   :  { %260 = vsyncmov [#allocation3] }
 0x120   :  { %s261_s26 = vpop.sfrf %260 }
 0x121   :  { %p410_p9 = scmp.ne.s32.totalorder %s261_s26, 0 }
 0x123   :  { %265 = shalt.err (%p410_p9)  }
 0x124   :  { %267 = vsyncmov [#allocation3 + $0x1] }
 0x127   :  { %s268_s28 = vpop.sfrf %267 }
 0x128   :  { %p411_p7 = scmp.ne.s32.totalorder %s268_s28, 0 }
 0x12a   :  { %272 = shalt.err (%p411_p7)  }
 0x12b   :  { %274 = vsyncmov [#allocation3 + $0x2] }
 0x12e   :  { %s275_s18 = vpop.sfrf %274 }
 0x12f   :  { %p412_p12 = scmp.ne.s32.totalorder %s275_s18, 0 }
 0x131   :  { %279 = shalt.err (%p412_p12)  }
 0x132   :  { %281 = vsyncmov [#allocation3 + $0x3] }
 0x135   :  { %s282_s20 = vpop.sfrf %281 }
 0x136   :  { %p413_p0 = scmp.ne.s32.totalorder %s282_s20, 0 }
 0x138   :  { %286 = shalt.err (%p413_p0)  }
 0x139   :  { %288 = vsyncmov [#allocation3 + $0x4] }
 0x13c   :  { %s289_s2 = vpop.sfrf %288 }
 0x13d   :  { %p414_p6 = scmp.ne.s32.totalorder %s289_s2, 0 }
 0x13f   :  { %293 = shalt.err (%p414_p6)  }
 0x140   :  { %295 = vsyncmov [#allocation3 + $0x5] }
 0x143   :  { %s296_s29 = vpop.sfrf %295 }
 0x144   :  { %p415_p1 = scmp.ne.s32.totalorder %s296_s29, 0 }
 0x146   :  { %300 = shalt.err (%p415_p1)  }
 0x147   :  { %302 = vsyncmov [#allocation3 + $0x6] }
 0x14a   :  { %s303_s30 = vpop.sfrf %302 }
 0x14b   :  { %p416_p13 = scmp.ne.s32.totalorder %s303_s30, 0 }
 0x14d   :  { %307 = shalt.err (%p416_p13)  }
 0x14e   :  { %309 = vsyncmov [#allocation3 + $0x7] }
 0x151   :  { %s310_s3 = vpop.sfrf %309 }
 0x152   :  { %p417_p2 = scmp.ne.s32.totalorder %s310_s3, 0 }
 0x154   :  { %314 = shalt.err (%p417_p2)  }

</bundles_post_ra>
